<compile_context>
chip_gen: v6e
topology: v6e:2x2x1
jax: 0.10.0
libtpu: 0.0.40
codegen_flags: <defaults>
</compile_context>

<pallas_src>
from functools import partial

import jax
import jax.numpy as jnp
from jax import lax
from jax.experimental import pallas as pl
from jax.experimental.pallas import tpu as pltpu


def _round_up(n, m):
    return ((n + m - 1) // m) * m


def _rvq_kernel(x_ref, cbT_ref, cb_ref, cbsqh_ref, qout_ref, idx_ref, *,
                num_quantizers, codebook_size):
    """One tile of rows: run all residual-VQ stages sequentially in VMEM/vregs.

    x_ref     : (TM, D)   input rows (residual stream), f32
    cbT_ref   : (Q, D, C) pre-cast, pre-transposed bf16 codebooks (distance matmul)
    cb_ref    : (Q, C, D) exact f32 codebooks (one-hot gather)
    cbsqh_ref : (Q, C)    precomputed 0.5 * ||codebook||^2, f32
    qout_ref  : (TM, D)   sum of quantized vectors over all quantizers
    idx_ref   : (TM, Q)   chosen codebook index per quantizer (int32)
    """
    x = x_ref[...].astype(jnp.float32)                      # (TM, D)
    residual = x
    tm = x.shape[0]
    C = codebook_size
    Q = num_quantizers

    # Loop-invariant iotas, hoisted (JAX does not CSE broadcast_in_dim).
    col = lax.broadcasted_iota(jnp.int32, (tm, C), 1)
    qcol = lax.broadcasted_iota(jnp.int32, (tm, Q), 1)
    idx_all = jnp.zeros((tm, Q), jnp.int32)

    for q in range(Q):                                      # small static loop
        cb_t = cbT_ref[q]                                   # (D, C) bf16 (pre-transposed)

        # Half squared distance argmin: 0.5*||r||^2 - r.e + 0.5*||e||^2; the
        # per-row 0.5*||r||^2 term is constant so it is dropped.  The matmul
        # runs in bf16 on the MXU with f32 accumulation; distance arithmetic
        # and the argmin stay in f32.
        dots = lax.dot_general(residual.astype(jnp.bfloat16), cb_t,
                               (((1,), (0,)), ((), ())),
                               preferred_element_type=jnp.float32)   # (TM, C)
        dist = cbsqh_ref[q:q + 1, :] - dots                 # (TM, C) f32

        # First-index-of-minimum (torch.argmin tie-breaking): two exact lane
        # reductions (XLU).  NOTE: at D=32/C=128 these reductions + per-step
        # overhead, not the MXU, are the likely crit path (see review item 9).
        min_d = jnp.min(dist, axis=-1, keepdims=True)       # (TM, 1)
        idx_col = jnp.min(jnp.where(dist == min_d, col, C),
                          axis=-1, keepdims=True)           # (TM, 1) int32

        # Gather codebook rows via one-hot matmul (MXU-friendly, exact in f32
        # so quantized values are bit-exact codebook entries).
        onehot = (col == idx_col).astype(jnp.float32)       # (TM, C)
        quantized = jnp.dot(onehot, cb_ref[q],
                            preferred_element_type=jnp.float32)      # (TM, D)

        residual = residual - quantized
        # Merge this quantizer's indices into the (TM, Q) register array; one
        # batched store at the end (v5e has a single vector-store slot).
        idx_all = jnp.where(qcol == q, idx_col, idx_all)

    # quantized_out == sum_q quantized_q == x - final residual (ULP-level
    # reassociation difference only).
    qout_ref[...] = (x - residual).astype(qout_ref.dtype)
    idx_ref[...] = idx_all


def residual_vq_forward(x, codebooks, *, tile_m=2048, min_grid_steps=2):
    """Eval-mode ResidualVQ forward.

    x         : (B, N, D) float32
    codebooks : (Q, C, D) float32  (layer._codebook.embed stacked over quantizers)
    Returns (quantized_out (B,N,D), all_indices (B,N,Q) int32, all_losses (1,Q)).
    """
    B, N, D = x.shape
    Q, C, Dc = codebooks.shape
    assert Dc == D
    assert tile_m % 8 == 0 and tile_m > 0

    M = B * N
    x_flat = x.reshape(M, D)

    # Row tile: big enough to amortize the ~0.35us per-grid-step overhead and
    # let BlockSpec double-buffering overlap the (tm, D) DMAs with compute,
    # capped by the (8-rounded) problem size.  When the problem allows, keep at
    # least `min_grid_steps` tiles so the "parallel" row axis can shard across
    # both TensorCores on v7x (no-op on single-TC v5e/v6e).
    m8 = _round_up(M, 8)
    tm = min(tile_m, m8)
    if m8 // tm < min_grid_steps and m8 > 8 * min_grid_steps:
        tm = _round_up(-(-m8 // min_grid_steps), 8)
    m_pad = _round_up(M, tm)
    if m_pad != M:
        x_flat = jnp.pad(x_flat, ((0, m_pad - M), (0, 0)))

    # Constants computed once in the wrapper (constant index_maps below keep
    # them VMEM-resident across all grid steps):
    cb_f32 = codebooks.astype(jnp.float32)
    cb_sq_half = 0.5 * jnp.sum(cb_f32 * cb_f32, axis=-1)              # (Q, C)
    cb_bf16_t = jnp.swapaxes(cb_f32.astype(jnp.bfloat16), 1, 2)       # (Q, D, C)

    kernel = partial(_rvq_kernel, num_quantizers=Q, codebook_size=C)

    # VMEM budget from the actual footprint: double-buffered row tiles and
    # constant blocks (default pipelining allocates 2 buffers even for
    # constant index_maps) plus per-stage (tm, C) transients, with margin.
    tile_bytes = tm * D * 4                                 # x tile (f32)
    out_bytes = tm * D * 4 + tm * Q * 4                     # qout + idx tiles
    const_bytes = Q * C * D * 4 + Q * D * C * 2 + Q * C * 4 # f32 cb + bf16 cbT + norms
    transient_bytes = 6 * tm * C * 4 + 8 * tm * D * 4       # dist/dots/onehot/iota etc.
    vmem_bytes = 2 * (tile_bytes + out_bytes + const_bytes) + transient_bytes + (4 << 20)
    vmem_limit = int(min(max(vmem_bytes, 32 << 20), 128 << 20))

    cost = pl.CostEstimate(
        flops=4 * M * Q * C * D,                            # distance + gather matmuls
        transcendentals=0,
        bytes_accessed=2 * M * D * 4 + M * Q * 4 + const_bytes,
    )

    qout_flat, idx_flat = pl.pallas_call(
        kernel,
        out_shape=(
            jax.ShapeDtypeStruct((m_pad, D), x.dtype),
            jax.ShapeDtypeStruct((m_pad, Q), jnp.int32),
        ),
        grid_spec=pltpu.PrefetchScalarGridSpec(
            num_scalar_prefetch=0,
            grid=(m_pad // tm,),
            in_specs=[
                pl.BlockSpec((tm, D), lambda i: (i, 0)),          # row tile
                # Constant blocks: fetched once, resident across grid steps.
                pl.BlockSpec((Q, D, C), lambda i: (0, 0, 0)),     # bf16 codebook^T
                pl.BlockSpec((Q, C, D), lambda i: (0, 0, 0)),     # f32 codebook
                pl.BlockSpec((Q, C), lambda i: (0, 0)),           # 0.5*||e||^2
            ],
            out_specs=[
                pl.BlockSpec((tm, D), lambda i: (i, 0)),
                # (tm, Q) index block is lane-sparse (Q << 128) but tiny in
                # absolute bytes; a lane-dense relayout costs more than it saves.
                pl.BlockSpec((tm, Q), lambda i: (i, 0)),
            ],
        ),
        compiler_params=pltpu.CompilerParams(
            # Independent row tiles -> megacore sharding on multi-TC chips.
            dimension_semantics=("parallel",),
            vmem_limit_bytes=vmem_limit,
        ),
        cost_estimate=cost,
    )(x_flat, cb_bf16_t, cb_f32, cb_sq_half)

    quantized_out = qout_flat[:M].reshape(B, N, D)
    all_indices = idx_flat[:M].reshape(B, N, Q)
    # Eval-mode VectorQuantize returns a (1,)-shaped zero commit loss per
    # layer; stacking along dim=-1 gives (1, Q).
    # TODO(synk): training-mode pieces (commit loss, EMA codebook update,
    # quantize-dropout, indices/cross-entropy path, return_all_codes) are not
    # implemented.
    all_losses = jnp.zeros((1, Q), dtype=x.dtype)
    return quantized_out, all_indices, all_losses


# ---------------------------------------------------------------------------
# Pure-JAX reference + validation helpers
# ---------------------------------------------------------------------------

def _reference_forward(x, codebooks):
    """Pure-JAX reference of the same eval-mode forward, matching the kernel's
    precision choices (bf16 MXU distance matmul with f32 accumulation, f32
    half-distances/argmin, exact f32 codebook gather)."""
    B, N, D = x.shape
    Q, C, _ = codebooks.shape
    residual = x.reshape(B * N, D).astype(jnp.float32)
    cb_sq_half = 0.5 * jnp.sum(codebooks.astype(jnp.float32) ** 2, axis=-1)  # (Q, C)
    qout = jnp.zeros_like(residual)
    idxs = []
    for q in range(Q):
        cb = codebooks[q].astype(jnp.float32)
        dots = jnp.dot(residual.astype(jnp.bfloat16),
                       cb.astype(jnp.bfloat16).T,
                       preferred_element_type=jnp.float32)
        dist = cb_sq_half[q][None, :] - dots
        idx = jnp.argmin(dist, axis=-1)
        quantized = cb[idx]
        residual = residual - quantized
        qout = qout + quantized
        idxs.append(idx)
    return (qout.reshape(B, N, D),
            jnp.stack(idxs, axis=-1).reshape(B, N, Q).astype(jnp.int32))


def _codes_from_indices(codebooks, indices):
    """Sum of gathered codebook rows for the given per-quantizer indices."""
    B, N, Q = indices.shape
    flat = indices.reshape(-1, Q)
    out = jnp.zeros((flat.shape[0], codebooks.shape[-1]), jnp.float32)
    for q in range(Q):
        out = out + codebooks[q].astype(jnp.float32)[flat[:, q]]
    return out.reshape(B, N, -1)


def _greedy_optimal(x, codebooks, idx_kernel, tol=1e-3):
    """Check that, following the kernel's own index choices, every chosen code
    is within `tol` of the minimum half-distance at its stage (accepts
    legitimate near-tie flips caused by bf16 MXU rounding)."""
    B, N, D = x.shape
    Q, C, _ = codebooks.shape
    residual = x.reshape(B * N, D).astype(jnp.float32)
    cb_sq_half = 0.5 * jnp.sum(codebooks.astype(jnp.float32) ** 2, axis=-1)
    ik = idx_kernel.reshape(B * N, Q)
    rows = jnp.arange(B * N)
    ok = True
    for q in range(Q):
        cb = codebooks[q].astype(jnp.float32)
        dots = jnp.dot(residual.astype(jnp.bfloat16), cb.astype(jnp.bfloat16).T,
                       preferred_element_type=jnp.float32)
        dist = cb_sq_half[q][None, :] - dots
        chosen = dist[rows, ik[:, q]]
        ok = ok and bool(jnp.all(chosen <= dist.min(axis=-1) + tol))
        residual = residual - cb[ik[:, q]]
    return ok


if __name__ == "__main__":
    # ResidualVQ(dim=32, num_quantizers=4, codebook_size=128) — no projection
    # since codebook_dim defaults to dim (project_in/out are Identity).
    # N=9 makes M=18 so both runs exercise ragged-tail padding.
    B, N, D = 2, 9, 32
    Q, C = 4, 128

    key = jax.random.PRNGKey(0)
    kx, kc = jax.random.split(key)
    x = jax.random.normal(kx, (B, N, D), dtype=jnp.float32)
    codebooks = jax.random.normal(kc, (Q, C, D), dtype=jnp.float32)

    ref_q, ref_idx = _reference_forward(x, codebooks)

    # Run 1: small tile -> 3-step grid + padded ragged tail.
    q1, i1, l1 = residual_vq_forward(x, codebooks, tile_m=8)
    # Run 2: default large tile (capped + split to keep >= 2 grid steps).
    q2, i2, l2 = residual_vq_forward(x, codebooks)
    jax.block_until_ready((q1, i1, l1, q2, i2, l2))

    # Tiling must not change results (per-row computation is independent).
    assert jnp.array_equal(i1, i2)
    assert jnp.array_equal(q1, q2)

    for qo, io, lo in ((q1, i1, l1), (q2, i2, l2)):
        assert qo.shape == (B, N, D)
        assert io.shape == (B, N, Q)
        assert lo.shape == (1, Q)
        # Output must match the sum of the selected codebook rows (ULP-level
        # reassociation tolerance).
        assert jnp.allclose(qo, _codes_from_indices(codebooks, io),
                            atol=1e-5, rtol=1e-5)
        if jnp.array_equal(io, ref_idx):
            assert jnp.allclose(qo, ref_q, atol=1e-4, rtol=1e-4)
        else:
            # bf16 MXU rounding can legitimately flip near-tied argmins; accept
            # iff every chosen code is (near-)optimal along the kernel's path.
            assert _greedy_optimal(x, codebooks, io), "indices not greedy-optimal"

    print("KERNEL_OK")
</pallas_src>

<mosaic_0001>
module attributes {stable_mosaic.version = 11 : i64} {
  func.func @_rvq_kernel(%arg0: i32, %arg1: memref<8x32xf32, #tpu.memory_space<vmem>>, %arg2: memref<4x32x128xbf16, #tpu.memory_space<vmem>>, %arg3: memref<4x128x32xf32, #tpu.memory_space<vmem>>, %arg4: memref<4x128xf32, #tpu.memory_space<vmem>>, %arg5: memref<8x32xf32, #tpu.memory_space<vmem>>, %arg6: memref<8x4xi32, #tpu.memory_space<vmem>>) attributes {dimension_semantics = [#tpu.dimension_semantics<parallel>], iteration_bounds = array<i64: 3>, scalar_prefetch = 0 : i64, scratch_operands = 0 : i64, tpu.core_type = #tpu.core_type<tc>, window_params = [{transform_indices = @transform_0, window_bounds = array<i64: 8, 32>}, {pipeline_mode = #tpu.pipeline_mode<synchronous>, transform_indices = @transform_1, window_bounds = array<i64: 4, 32, 128>}, {pipeline_mode = #tpu.pipeline_mode<synchronous>, transform_indices = @transform_2, window_bounds = array<i64: 4, 128, 32>}, {pipeline_mode = #tpu.pipeline_mode<synchronous>, transform_indices = @transform_3, window_bounds = array<i64: 4, 128>}, {transform_indices = @transform_4, window_bounds = array<i64: 8, 32>}, {transform_indices = @transform_5, window_bounds = array<i64: 8, 4>}]} {
    %c0 = arith.constant 0 : index
    %c0_0 = arith.constant 0 : index
    %0 = vector.load %arg1[%c0, %c0_0] : memref<8x32xf32, #tpu.memory_space<vmem>>, vector<8x32xf32>
    %1 = tpu.iota {dimensions = array<i32: 1>} : vector<8x128xi32>
    %2 = tpu.iota {dimensions = array<i32: 1>} : vector<8x4xi32>
    %c0_i32 = arith.constant 0 : i32
    %3 = vector.broadcast %c0_i32 : i32 to vector<8x4xi32>
    %c0_1 = arith.constant 0 : index
    %c0_2 = arith.constant 0 : index
    %c0_3 = arith.constant 0 : index
    %4 = vector.load %arg2[%c0_1, %c0_2, %c0_3] : memref<4x32x128xbf16, #tpu.memory_space<vmem>>, vector<1x32x128xbf16>
    %5 = vector.shape_cast %4 : vector<1x32x128xbf16> to vector<32x128xbf16>
    %6 = arith.truncf %0 : vector<8x32xf32> to vector<8x32xbf16>
    %cst = arith.constant dense<0.000000e+00> : vector<8x128xf32>
    %7 = tpu.matmul %6, %5, %cst {dimension_numbers = #tpu.dot_dimension_numbers<[1], [0], [0], [1], [0, 0, 1, 1], [], []>} : vector<8x32xbf16>, vector<32x128xbf16>, vector<8x128xf32> -> vector<8x128xf32>
    %c0_4 = arith.constant 0 : index
    %c0_5 = arith.constant 0 : index
    %8 = vector.load %arg4[%c0_4, %c0_5] : memref<4x128xf32, #tpu.memory_space<vmem>>, vector<1x128xf32>
    %9 = vector.broadcast %8 : vector<1x128xf32> to vector<8x128xf32>
    %10 = arith.subf %9, %7 : vector<8x128xf32>
    %cst_6 = arith.constant dense<0x7F800000> : vector<8xf32>
    %11 = vector.multi_reduction <minimumf>, %10, %cst_6 [1] : vector<8x128xf32> to vector<8xf32>
    %12 = vector.shape_cast %11 : vector<8xf32> to vector<8x1xf32>
    %13 = vector.broadcast %12 : vector<8x1xf32> to vector<8x128xf32>
    %14 = arith.cmpf oeq, %10, %13 : vector<8x128xf32>
    %c128_i32 = arith.constant 128 : i32
    %15 = vector.broadcast %c128_i32 : i32 to vector<8x128xi32>
    %16 = arith.select %14, %1, %15 : vector<8x128xi1>, vector<8x128xi32>
    %cst_7 = arith.constant dense<2147483647> : vector<8xi32>
    %17 = vector.multi_reduction <minsi>, %16, %cst_7 [1] : vector<8x128xi32> to vector<8xi32>
    %18 = vector.shape_cast %17 : vector<8xi32> to vector<8x1xi32>
    %19 = vector.broadcast %18 : vector<8x1xi32> to vector<8x128xi32>
    %20 = arith.cmpi eq, %1, %19 : vector<8x128xi32>
    %21 = arith.extui %20 : vector<8x128xi1> to vector<8x128xi32>
    %22 = arith.sitofp %21 : vector<8x128xi32> to vector<8x128xf32>
    %c0_8 = arith.constant 0 : index
    %c0_9 = arith.constant 0 : index
    %c0_10 = arith.constant 0 : index
    %23 = vector.load %arg3[%c0_8, %c0_9, %c0_10] : memref<4x128x32xf32, #tpu.memory_space<vmem>>, vector<1x128x32xf32>
    %24 = vector.shape_cast %23 : vector<1x128x32xf32> to vector<128x32xf32>
    %cst_11 = arith.constant dense<0.000000e+00> : vector<8x32xf32>
    %25 = tpu.matmul %22, %24, %cst_11 {dimension_numbers = #tpu.dot_dimension_numbers<[1], [0], [0], [1], [0, 0, 1, 1], [], []>} : vector<8x128xf32>, vector<128x32xf32>, vector<8x32xf32> -> vector<8x32xf32>
    %26 = arith.subf %0, %25 : vector<8x32xf32>
    %c0_i32_12 = arith.constant 0 : i32
    %27 = vector.broadcast %c0_i32_12 : i32 to vector<8x4xi32>
    %28 = arith.cmpi eq, %2, %27 : vector<8x4xi32>
    %29 = vector.shape_cast %18 : vector<8x1xi32> to vector<8x1xi32>
    %30 = vector.broadcast %29 : vector<8x1xi32> to vector<8x4xi32>
    %31 = arith.select %28, %30, %3 : vector<8x4xi1>, vector<8x4xi32>
    %c1 = arith.constant 1 : index
    %c0_13 = arith.constant 0 : index
    %c0_14 = arith.constant 0 : index
    %32 = vector.load %arg2[%c1, %c0_13, %c0_14] : memref<4x32x128xbf16, #tpu.memory_space<vmem>>, vector<1x32x128xbf16>
    %33 = vector.shape_cast %32 : vector<1x32x128xbf16> to vector<32x128xbf16>
    %34 = arith.truncf %26 : vector<8x32xf32> to vector<8x32xbf16>
    %cst_15 = arith.constant dense<0.000000e+00> : vector<8x128xf32>
    %35 = tpu.matmul %34, %33, %cst_15 {dimension_numbers = #tpu.dot_dimension_numbers<[1], [0], [0], [1], [0, 0, 1, 1], [], []>} : vector<8x32xbf16>, vector<32x128xbf16>, vector<8x128xf32> -> vector<8x128xf32>
    %c1_16 = arith.constant 1 : index
    %c0_17 = arith.constant 0 : index
    %36 = vector.load %arg4[%c1_16, %c0_17] : memref<4x128xf32, #tpu.memory_space<vmem>>, vector<1x128xf32>
    %37 = vector.broadcast %36 : vector<1x128xf32> to vector<8x128xf32>
    %38 = arith.subf %37, %35 : vector<8x128xf32>
    %cst_18 = arith.constant dense<0x7F800000> : vector<8xf32>
    %39 = vector.multi_reduction <minimumf>, %38, %cst_18 [1] : vector<8x128xf32> to vector<8xf32>
    %40 = vector.shape_cast %39 : vector<8xf32> to vector<8x1xf32>
    %41 = vector.broadcast %40 : vector<8x1xf32> to vector<8x128xf32>
    %42 = arith.cmpf oeq, %38, %41 : vector<8x128xf32>
    %c128_i32_19 = arith.constant 128 : i32
    %43 = vector.broadcast %c128_i32_19 : i32 to vector<8x128xi32>
    %44 = arith.select %42, %1, %43 : vector<8x128xi1>, vector<8x128xi32>
    %cst_20 = arith.constant dense<2147483647> : vector<8xi32>
    %45 = vector.multi_reduction <minsi>, %44, %cst_20 [1] : vector<8x128xi32> to vector<8xi32>
    %46 = vector.shape_cast %45 : vector<8xi32> to vector<8x1xi32>
    %47 = vector.broadcast %46 : vector<8x1xi32> to vector<8x128xi32>
    %48 = arith.cmpi eq, %1, %47 : vector<8x128xi32>
    %49 = arith.extui %48 : vector<8x128xi1> to vector<8x128xi32>
    %50 = arith.sitofp %49 : vector<8x128xi32> to vector<8x128xf32>
    %c1_21 = arith.constant 1 : index
    %c0_22 = arith.constant 0 : index
    %c0_23 = arith.constant 0 : index
    %51 = vector.load %arg3[%c1_21, %c0_22, %c0_23] : memref<4x128x32xf32, #tpu.memory_space<vmem>>, vector<1x128x32xf32>
    %52 = vector.shape_cast %51 : vector<1x128x32xf32> to vector<128x32xf32>
    %cst_24 = arith.constant dense<0.000000e+00> : vector<8x32xf32>
    %53 = tpu.matmul %50, %52, %cst_24 {dimension_numbers = #tpu.dot_dimension_numbers<[1], [0], [0], [1], [0, 0, 1, 1], [], []>} : vector<8x128xf32>, vector<128x32xf32>, vector<8x32xf32> -> vector<8x32xf32>
    %54 = arith.subf %26, %53 : vector<8x32xf32>
    %c1_i32 = arith.constant 1 : i32
    %55 = vector.broadcast %c1_i32 : i32 to vector<8x4xi32>
    %56 = arith.cmpi eq, %2, %55 : vector<8x4xi32>
    %57 = vector.shape_cast %46 : vector<8x1xi32> to vector<8x1xi32>
    %58 = vector.broadcast %57 : vector<8x1xi32> to vector<8x4xi32>
    %59 = arith.select %56, %58, %31 : vector<8x4xi1>, vector<8x4xi32>
    %c2 = arith.constant 2 : index
    %c0_25 = arith.constant 0 : index
    %c0_26 = arith.constant 0 : index
    %60 = vector.load %arg2[%c2, %c0_25, %c0_26] : memref<4x32x128xbf16, #tpu.memory_space<vmem>>, vector<1x32x128xbf16>
    %61 = vector.shape_cast %60 : vector<1x32x128xbf16> to vector<32x128xbf16>
    %62 = arith.truncf %54 : vector<8x32xf32> to vector<8x32xbf16>
    %cst_27 = arith.constant dense<0.000000e+00> : vector<8x128xf32>
    %63 = tpu.matmul %62, %61, %cst_27 {dimension_numbers = #tpu.dot_dimension_numbers<[1], [0], [0], [1], [0, 0, 1, 1], [], []>} : vector<8x32xbf16>, vector<32x128xbf16>, vector<8x128xf32> -> vector<8x128xf32>
    %c2_28 = arith.constant 2 : index
    %c0_29 = arith.constant 0 : index
    %64 = vector.load %arg4[%c2_28, %c0_29] : memref<4x128xf32, #tpu.memory_space<vmem>>, vector<1x128xf32>
    %65 = vector.broadcast %64 : vector<1x128xf32> to vector<8x128xf32>
    %66 = arith.subf %65, %63 : vector<8x128xf32>
    %cst_30 = arith.constant dense<0x7F800000> : vector<8xf32>
    %67 = vector.multi_reduction <minimumf>, %66, %cst_30 [1] : vector<8x128xf32> to vector<8xf32>
    %68 = vector.shape_cast %67 : vector<8xf32> to vector<8x1xf32>
    %69 = vector.broadcast %68 : vector<8x1xf32> to vector<8x128xf32>
    %70 = arith.cmpf oeq, %66, %69 : vector<8x128xf32>
    %c128_i32_31 = arith.constant 128 : i32
    %71 = vector.broadcast %c128_i32_31 : i32 to vector<8x128xi32>
    %72 = arith.select %70, %1, %71 : vector<8x128xi1>, vector<8x128xi32>
    %cst_32 = arith.constant dense<2147483647> : vector<8xi32>
    %73 = vector.multi_reduction <minsi>, %72, %cst_32 [1] : vector<8x128xi32> to vector<8xi32>
    %74 = vector.shape_cast %73 : vector<8xi32> to vector<8x1xi32>
    %75 = vector.broadcast %74 : vector<8x1xi32> to vector<8x128xi32>
    %76 = arith.cmpi eq, %1, %75 : vector<8x128xi32>
    %77 = arith.extui %76 : vector<8x128xi1> to vector<8x128xi32>
    %78 = arith.sitofp %77 : vector<8x128xi32> to vector<8x128xf32>
    %c2_33 = arith.constant 2 : index
    %c0_34 = arith.constant 0 : index
    %c0_35 = arith.constant 0 : index
    %79 = vector.load %arg3[%c2_33, %c0_34, %c0_35] : memref<4x128x32xf32, #tpu.memory_space<vmem>>, vector<1x128x32xf32>
    %80 = vector.shape_cast %79 : vector<1x128x32xf32> to vector<128x32xf32>
    %cst_36 = arith.constant dense<0.000000e+00> : vector<8x32xf32>
    %81 = tpu.matmul %78, %80, %cst_36 {dimension_numbers = #tpu.dot_dimension_numbers<[1], [0], [0], [1], [0, 0, 1, 1], [], []>} : vector<8x128xf32>, vector<128x32xf32>, vector<8x32xf32> -> vector<8x32xf32>
    %82 = arith.subf %54, %81 : vector<8x32xf32>
    %c2_i32 = arith.constant 2 : i32
    %83 = vector.broadcast %c2_i32 : i32 to vector<8x4xi32>
    %84 = arith.cmpi eq, %2, %83 : vector<8x4xi32>
    %85 = vector.shape_cast %74 : vector<8x1xi32> to vector<8x1xi32>
    %86 = vector.broadcast %85 : vector<8x1xi32> to vector<8x4xi32>
    %87 = arith.select %84, %86, %59 : vector<8x4xi1>, vector<8x4xi32>
    %c3 = arith.constant 3 : index
    %c0_37 = arith.constant 0 : index
    %c0_38 = arith.constant 0 : index
    %88 = vector.load %arg2[%c3, %c0_37, %c0_38] : memref<4x32x128xbf16, #tpu.memory_space<vmem>>, vector<1x32x128xbf16>
    %89 = vector.shape_cast %88 : vector<1x32x128xbf16> to vector<32x128xbf16>
    %90 = arith.truncf %82 : vector<8x32xf32> to vector<8x32xbf16>
    %cst_39 = arith.constant dense<0.000000e+00> : vector<8x128xf32>
    %91 = tpu.matmul %90, %89, %cst_39 {dimension_numbers = #tpu.dot_dimension_numbers<[1], [0], [0], [1], [0, 0, 1, 1], [], []>} : vector<8x32xbf16>, vector<32x128xbf16>, vector<8x128xf32> -> vector<8x128xf32>
    %c3_40 = arith.constant 3 : index
    %c0_41 = arith.constant 0 : index
    %92 = vector.load %arg4[%c3_40, %c0_41] : memref<4x128xf32, #tpu.memory_space<vmem>>, vector<1x128xf32>
    %93 = vector.broadcast %92 : vector<1x128xf32> to vector<8x128xf32>
    %94 = arith.subf %93, %91 : vector<8x128xf32>
    %cst_42 = arith.constant dense<0x7F800000> : vector<8xf32>
    %95 = vector.multi_reduction <minimumf>, %94, %cst_42 [1] : vector<8x128xf32> to vector<8xf32>
    %96 = vector.shape_cast %95 : vector<8xf32> to vector<8x1xf32>
    %97 = vector.broadcast %96 : vector<8x1xf32> to vector<8x128xf32>
    %98 = arith.cmpf oeq, %94, %97 : vector<8x128xf32>
    %c128_i32_43 = arith.constant 128 : i32
    %99 = vector.broadcast %c128_i32_43 : i32 to vector<8x128xi32>
    %100 = arith.select %98, %1, %99 : vector<8x128xi1>, vector<8x128xi32>
    %cst_44 = arith.constant dense<2147483647> : vector<8xi32>
    %101 = vector.multi_reduction <minsi>, %100, %cst_44 [1] : vector<8x128xi32> to vector<8xi32>
    %102 = vector.shape_cast %101 : vector<8xi32> to vector<8x1xi32>
    %103 = vector.broadcast %102 : vector<8x1xi32> to vector<8x128xi32>
    %104 = arith.cmpi eq, %1, %103 : vector<8x128xi32>
    %105 = arith.extui %104 : vector<8x128xi1> to vector<8x128xi32>
    %106 = arith.sitofp %105 : vector<8x128xi32> to vector<8x128xf32>
    %c3_45 = arith.constant 3 : index
    %c0_46 = arith.constant 0 : index
    %c0_47 = arith.constant 0 : index
    %107 = vector.load %arg3[%c3_45, %c0_46, %c0_47] : memref<4x128x32xf32, #tpu.memory_space<vmem>>, vector<1x128x32xf32>
    %108 = vector.shape_cast %107 : vector<1x128x32xf32> to vector<128x32xf32>
    %cst_48 = arith.constant dense<0.000000e+00> : vector<8x32xf32>
    %109 = tpu.matmul %106, %108, %cst_48 {dimension_numbers = #tpu.dot_dimension_numbers<[1], [0], [0], [1], [0, 0, 1, 1], [], []>} : vector<8x128xf32>, vector<128x32xf32>, vector<8x32xf32> -> vector<8x32xf32>
    %110 = arith.subf %82, %109 : vector<8x32xf32>
    %c3_i32 = arith.constant 3 : i32
    %111 = vector.broadcast %c3_i32 : i32 to vector<8x4xi32>
    %112 = arith.cmpi eq, %2, %111 : vector<8x4xi32>
    %113 = vector.shape_cast %102 : vector<8x1xi32> to vector<8x1xi32>
    %114 = vector.broadcast %113 : vector<8x1xi32> to vector<8x4xi32>
    %115 = arith.select %112, %114, %87 : vector<8x4xi1>, vector<8x4xi32>
    %116 = arith.subf %0, %110 : vector<8x32xf32>
    %c0_49 = arith.constant 0 : index
    %c0_50 = arith.constant 0 : index
    %117 = vector.load %arg5[%c0_49, %c0_50] : memref<8x32xf32, #tpu.memory_space<vmem>>, vector<8x32xf32>
    tpu.vector_store %arg5[%c0_49, %c0_50], %116 {strides = array<i32>} : memref<8x32xf32, #tpu.memory_space<vmem>>, vector<8x32xf32>,
    %c0_51 = arith.constant 0 : index
    %c0_52 = arith.constant 0 : index
    %118 = vector.load %arg6[%c0_51, %c0_52] : memref<8x4xi32, #tpu.memory_space<vmem>>, vector<8x4xi32>
    tpu.vector_store %arg6[%c0_51, %c0_52], %115 {strides = array<i32>} : memref<8x4xi32, #tpu.memory_space<vmem>>, vector<8x4xi32>,
    return
  }
  func.func @transform_0(%arg0: i32) -> (i32, i32) {
    %c0_i32 = arith.constant 0 : i32
    %c0_i32_0 = arith.constant 0 : i32
    return %arg0, %c0_i32 : i32, i32
  }
  func.func @transform_1(%arg0: i32) -> (i32, i32, i32) {
    %c0_i32 = arith.constant 0 : i32
    %c0_i32_0 = arith.constant 0 : i32
    %c0_i32_1 = arith.constant 0 : i32
    %c0_i32_2 = arith.constant 0 : i32
    return %c0_i32, %c0_i32_0, %c0_i32_1 : i32, i32, i32
  }
  func.func @transform_2(%arg0: i32) -> (i32, i32, i32) {
    %c0_i32 = arith.constant 0 : i32
    %c0_i32_0 = arith.constant 0 : i32
    %c0_i32_1 = arith.constant 0 : i32
    %c0_i32_2 = arith.constant 0 : i32
    return %c0_i32, %c0_i32_0, %c0_i32_1 : i32, i32, i32
  }
  func.func @transform_3(%arg0: i32) -> (i32, i32) {
    %c0_i32 = arith.constant 0 : i32
    %c0_i32_0 = arith.constant 0 : i32
    %c0_i32_1 = arith.constant 0 : i32
    return %c0_i32, %c0_i32_0 : i32, i32
  }
  func.func @transform_4(%arg0: i32) -> (i32, i32) {
    %c0_i32 = arith.constant 0 : i32
    %c0_i32_0 = arith.constant 0 : i32
    return %arg0, %c0_i32 : i32, i32
  }
  func.func @transform_5(%arg0: i32) -> (i32, i32) {
    %c0_i32 = arith.constant 0 : i32
    %c0_i32_0 = arith.constant 0 : i32
    return %arg0, %c0_i32 : i32, i32
  }
}

</mosaic_0001>

<bundles_post_ra>
// kernel: tpu_custom_call.1
= control target key start
LH: loop header
LB: loop body
LE: loop exit
PB: predicated region body
PF: predicated region fallthrough
CT: control target
= control target key end

     0   :  { %11 = vsyncpa [#allocation3], 0  ;;  %s2014_s0 = inlined_call_operand.vmem [shape: f32[24,32], index: 0, kind: input, shape index: {}]   ;;  %s2015_s1 = inlined_call_operand.vmem [shape: bf16[4,32,128], index: 1, kind: input, shape index: {}]   ;;  %s2016_s2 = inlined_call_operand.vmem [shape: f32[4,128,32], index: 2, kind: input, shape index: {}]   ;;  %s2017_s3 = inlined_call_operand.vmem [shape: f32[4,128], index: 3, kind: input, shape index: {}]   ;;  %s2018_s4 = inlined_call_operand.hbm [shape: f32[24,32], index: 4, kind: output, shape index: {0}]   ;;  %s2019_s5 = inlined_call_operand.vmem [shape: s32[24,4], index: 5, kind: output, shape index: {1}]  }
   0x1   :  { %13 = vsyncpa [#allocation3 + $0x1], 0  ;;  %s1547_s18 = smov 0   ;;  %s1549_s19 = smov 0  }
   0x2   :  { %s1551_s20 = smov 0   ;;  %s1553_s21 = smov 0  }
   0x3 LB: > { %s1568_s22 = sadd.s32 4294967295, %s1511_s21   ;;  %s1054_s23 = sadd.s32 4294967294, %s1511_s21   ;;  %s1511_s21 = sphi %s1553_s21, %s2025_s21   ;;  %s1507_s20 = sphi %s1551_s20, %s2024_s20   ;;  %s1503_s19 = sphi %s1549_s19, %s2023_s19   ;;  %s1499_s18 = sphi %s1547_s18, %s2022_s18  }
   0x4   : > { %s1572_s24 = sadd.s32 1, %s1511_s21   ;;  %s115_s25 = sadd.s32 1, %s1507_s20 }
   0x5   : > { %s112_s26 = ssub.s32 %s1511_s21, %s1572_s24  ;;  %p125_p0 = scmp.ne.s32.totalorder %s1507_s20, %s1503_s19 }
   0x6   : > { %p113_p1 = scmp.eq.s32.totalorder %s112_s26, 0  ;;  %p126_p2 = scmp.eq.s32.totalorder %s1568_s22, 2 }
   0x7   : > { %p131_p3 = scmp.ne.s32.totalorder %s1503_s19, %s1499_s18  ;;  %p132_p4 = scmp.eq.s32.totalorder %s1054_s23, 2 }
   0x8   : > { %s1583_s27 = scalar_select %p113_p1, %s1507_s20, %s115_s25  }
   0x9   : > { %p1585_p5 = por %p126_p2, %p125_p0  ;;  %p1589_p6 = por %p132_p4, %p131_p3 }
   0xa   : > { %p1057_p7 = scmp.ge.s32.totalorder %s1511_s21, 1  ;;  %p192_p8 = scmp.lt.s32.totalorder %s1511_s21, 4 }
   0xc   : > { %p193_p9 = pnand %p1057_p7, %p192_p8 }
   0xd   : > { %p223_p10 = scmp.lt.s32.totalorder (!%p193_p9), %s1568_s22, 2  ;;  %s214_s11 = sand.u32 (!%p193_p9), 1, %s1503_s19  }
   0xe   : > { %196 = sbr.rel (%p193_p9) target bundleno = 3317 (0xcf5), region = 36  ;;  %s1058_s12 = sshll.u32 (!%p193_p9), %s214_s11, 3 }
   0xf   : > { %s216_s14 = scalar_lea.vmem (!%p193_p9), [#allocation2], %s1058_s12  ;;  %s951_s17 = scalar_lea.sflag (!%p193_p9), [#allocation3], %s214_s11 }
  0x13   : > { %v1443_v0 = vld [vmem:[%s2015_s1 + $0x8] sm:$0xff]   ;;  %v1513_v1 = vmov 0.0   ;;  %v1444_v2 = vld [vmem:[%s2015_s1] sm:$0xff]   ;;  %vm1514_vm0 = vmmov 0   ;;  %s1610_s9 = scalar_select %p223_p10, %s1568_s22, 2  ;;  %vm252_vm1 = vcmask 261120   ;;  %v233_v11 = vlaneseq }
  0x14   : > { %1229 = vmatprep.subr.bf16.mxu1 %v1513_v1  ;;  %1272 = vmatprep.subr.bf16.mxu0 %v1513_v1  ;;  %v1064_v5 = vld [vmem:[%s2017_s3] ss:$0 sm:$0xff]  ;;  %v338_v17 = vld [vmem:[%s2016_s2 + $0x78] sm:$0xff]  ;;  %v337_v18 = vld [vmem:[%s2016_s2 + $0x70] sm:$0xff]  ;;  %v1515_v43 = vmov 1.0  }
  0x15   : > { %1230 = vmatpush3.bf16.msra.mxu1 %v1443_v0  ;;  %1233 = vmatprep.mubr.msk.bf16.mxu1 %vm1514_vm0, %v1513_v1  ;;  %s1059_s10 = sshll.u32 %s1610_s9, 3  ;;  %v1629_v12 = vand.u32 127, %v233_v11  ;;  %v336_v19 = vld [vmem:[%s2016_s2 + $0x68] sm:$0xff]  ;;  %v335_v20 = vld [vmem:[%s2016_s2 + $0x60] sm:$0xff]  ;;  %v334_v21 = vld [vmem:[%s2016_s2 + $0x58] sm:$0xff]  ;;  %s968_s9 = sshll.u32 %s216_s14, 4  ;;  %s969_s9 = int_to_ptr.vmem [resolvable:$true] %s968_s9 }
  0x16   : > { %1231 = vmatprep.subr.bf16.mxu1 %v1513_v1  ;;  %1276 = vmatprep.mubr.msk.bf16.mxu0 %vm1514_vm0, %v1513_v1  ;;  %s226_s13 = scalar_lea.vmem %s2014_s0, %s1059_s10  ;;  %v333_v22 = vld [vmem:[%s2016_s2 + $0x50] sm:$0xff]  ;;  %v332_v23 = vld [vmem:[%s2016_s2 + $0x48] sm:$0xff]  ;;  %v331_v24 = vld [vmem:[%s2016_s2 + $0x40] sm:$0xff]  ;;  %s230_s8 = scalar_lea.vmem %s2019_s5, %s1059_s10 }
  0x17   : > { %v1619_v3 = vld [vmem:[%s226_s13] sm:$0xff]  ;;  %v330_v25 = vld [vmem:[%s2016_s2 + $0x38] sm:$0xff]  ;;  %v329_v26 = vld [vmem:[%s2016_s2 + $0x30] sm:$0xff]  ;;  %vm410_vm7 = vcmp.eq.s32.totalorder %v1629_v12, 0  ;;  %vm588_vm8 = vcmp.eq.s32.totalorder %v1629_v12, 1  ;;  %vm766_vm12 = vcmp.eq.s32.totalorder %v1629_v12, 2 }
  0x18   : > { %v239_v4 = vpack.c.bf16 %v1619_v3, %v1619_v3  ;;  %v328_v27 = vld [vmem:[%s2016_s2 + $0x28] sm:$0xff]  ;;  %v327_v28 = vld [vmem:[%s2016_s2 + $0x20] sm:$0xff]  ;;  %v326_v29 = vld [vmem:[%s2016_s2 + $0x18] sm:$0xff]  ;;  %s1146_s13 = sshll.u32 %s1568_s22, 7  ;;  %s1451_s23 = scalar_lea.vmem %s969_s9, 128 }
  0x19   : > { %1232 = vmatpush3.bf16.msra.mxu1 %v1444_v2  ;;  %v325_v34 = vld [vmem:[%s2016_s2 + $0x10] sm:$0xff]  ;;  %v324_v35 = vld [vmem:[%s2016_s2 + $0x8] sm:$0xff]  ;;  %v323_v36 = vld [vmem:[%s2016_s2] sm:$0xff]  ;;  %s966_s16 = scalar_lea.hbm %s2018_s4, %s1146_s13  ;;  %p1452_p11 = scmp.ne.s32.totalorder %s969_s9, %s1451_s23 }
  0x1a   : > { %1237 = vmatprep.subr.mxu1 %v1513_v1  ;;  %v1445_v37 = vld [vmem:[%s2015_s1 + $0x18] sm:$0xff]   ;;  %v1446_v44 = vld [vmem:[%s2015_s1 + $0x10] sm:$0xff]   ;;  %v1074_v49 = vld [vmem:[%s2017_s3 + $0x1] ss:$0 sm:$0xff]  ;;  %s1516_s22 = smov [#allocation2]  }
  0x1b   : > { %1273 = vmatpush3.bf16.msra.mxu0 %v1445_v37  ;;  %v1091_v59 = vld [vmem:[%s2016_s2 + $0xf8] sm:$0xff]  ;;  %v1090_v60 = vld [vmem:[%s2016_s2 + $0xf0] sm:$0xff]  ;;  %v1089_v61 = vld [vmem:[%s2016_s2 + $0xe8] sm:$0xff]  ;;  %p1453_p12 = pnand %p1452_p11, %p1585_p5  ;;  %s1455_s25 = sshll.u32 %s1516_s22, 4  ;;  %s1456_s25 = int_to_ptr.vmem [resolvable:$false] %s1455_s25 }
  0x1c   : > { %1234 = vmatmul.mubr.msk.bf16.vlgmr.msra.gmra.mxu1 %vm252_vm1, %v239_v4  ;;  %1274 = vmatprep.subr.bf16.mxu0 %v1513_v1  ;;  %v1088_v62 = vld [vmem:[%s2016_s2 + $0xe0] sm:$0xff]  ;;  %v1087_v63 = vld [vmem:[%s2016_s2 + $0xd8] sm:$0xff]  ;;  %v1086_v0 = vld [vmem:[%s2016_s2 + $0xd0] sm:$0xff]  ;;  %s1457_s26 = scalar_lea.vmem %s1456_s25, 256  ;;  %p1458_p0 = scmp.lt.s32.totalorder %s969_s9, %s1456_s25 }
  0x1d   : > { %1269 = vmatprep.mubr.msk.f32.mxu1 %vm1514_vm0, %v1513_v1  ;;  %1238 = vmatpush3.msra.mxu1 %v338_v17  ;;  %v1085_v2 = vld [vmem:[%s2016_s2 + $0xc8] sm:$0xff]  ;;  %v1084_v4 = vld [vmem:[%s2016_s2 + $0xc0] sm:$0xff]  ;;  %p1454_p13 = pneg %p1453_p12  ;;  %p1459_p1 = scmp.lt.s32.totalorder %s1457_s26, %s1451_s23 }
  0x1e   : > { %1239 = vmatprep.subr.mxu1 %v1513_v1  ;;  %v1076_v17 = vld [vmem:[%s2016_s2 + $0x80] sm:$0xff] }
  0x1f   : > { %1240 = vmatpush3.msra.mxu1 %v337_v18  ;;  %1275 = vmatpush3.bf16.msra.mxu0 %v1446_v44  ;;  %v1447_v18 = vld [vmem:[%s2015_s1 + $0x28] sm:$0xff]   ;;  %p1460_p2 = por %p1459_p1, %p1458_p0 }
  0x20   : > { %1241 = vmatprep.subr.mxu1 %v1513_v1  ;;  %1280 = vmatprep.subr.mxu0 %v1513_v1  ;;  %v1115_v44 = vld [vmem:[%s2016_s2 + $0x168] sm:$0xff] }
  0x21   : > { %1242 = vmatpush3.msra.mxu1 %v336_v19  ;;  %p1461_p3 = pnand %p1460_p2, %p1454_p13 }
  0x22   : > { %1243 = vmatprep.subr.mxu1 %v1513_v1 }
  0x23   : > { %1244 = vmatpush3.msra.mxu1 %v335_v20 }
  0x24   : > { %1245 = vmatprep.subr.mxu1 %v1513_v1 }
  0x25   : > { %1246 = vmatpush3.msra.mxu1 %v334_v21 }
  0x26   : > { %1247 = vmatprep.subr.mxu1 %v1513_v1 }
  0x27   : > { %1248 = vmatpush3.msra.mxu1 %v333_v22 }
  0x28   : > { %1249 = vmatprep.subr.mxu1 %v1513_v1 }
  0x29   : > { %1250 = vmatpush3.msra.mxu1 %v332_v23 }
  0x2a   : > { %1251 = vmatprep.subr.mxu1 %v1513_v1 }
  0x2b   : > { %1252 = vmatpush3.msra.mxu1 %v331_v24 }
  0x2c   : > { %1253 = vmatprep.subr.mxu1 %v1513_v1 }
  0x2d   : > { %1254 = vmatpush3.msra.mxu1 %v330_v25 }
  0x2e   : > { %1255 = vmatprep.subr.mxu1 %v1513_v1 }
  0x2f   : > { %1256 = vmatpush3.msra.mxu1 %v329_v26  ;;  %v1448_v26 = vld [vmem:[%s2015_s1 + $0x20] sm:$0xff]  }
  0x30   : > { %1257 = vmatprep.subr.mxu1 %v1513_v1 }
  0x31   : > { %1258 = vmatpush3.msra.mxu1 %v328_v27 }
  0x32   : > { %1259 = vmatprep.subr.mxu1 %v1513_v1 }
  0x33   : > { %1260 = vmatpush3.msra.mxu1 %v327_v28 }
  0x34   : > { %1261 = vmatprep.subr.mxu1 %v1513_v1 }
  0x35   : > { %1262 = vmatpush3.msra.mxu1 %v326_v29 }
  0x36   : > { %1263 = vmatprep.subr.mxu1 %v1513_v1 }
  0x37   : > { %1264 = vmatpush3.msra.mxu1 %v325_v34 }
  0x38   : > { %1265 = vmatprep.subr.mxu1 %v1513_v1 }
  0x39   : > { %1266 = vmatpush3.msra.mxu1 %v324_v35 }
  0x3a   : > { %1267 = vmatprep.subr.mxu1 %v1513_v1 }
  0x3b   : > { %1268 = vmatpush3.msra.mxu1 %v323_v36 }
  0x3c   : > { %1315 = vmatprep.subr.bf16.mxu1 %v1513_v1 }
  0xdc   : > { %v290_v6 = vpop.f32.mrf.mxu1 }
  0xdd   : > { %v301_v7 = vsub.f32 %v1064_v5, %v290_v6  ;;  %v1083_v5 = vld [vmem:[%s2016_s2 + $0xb8] sm:$0xff]  ;;  %v1082_v6 = vld [vmem:[%s2016_s2 + $0xb0] sm:$0xff] }
  0xde   : > { %v1235_v8 = vpop.f32.mrf.mxu1 }
  0xdf   : > { %302 = vmin.xlane.f32.xlu0 %v301_v7  ;;  %v1080_v8 = vld [vmem:[%s2016_s2 + $0xa0] sm:$0xff] }
  0xe0   : > { %v293_v9 = vpop.f32.mrf.mxu1 }
  0xe1   : > { %v1079_v9 = vld [vmem:[%s2016_s2 + $0x98] sm:$0xff] }
  0xe2   : > { %v1236_v10 = vpop.f32.mrf.mxu1 }
 0x168   : > { %v303_v13 = vpop.xlane.xlu0 %302 }
 0x169   : > { %vm304_vm2 = vcmp.eq.f32.partialorder %v301_v7, %v303_v13  ;;  %v1081_v7 = vld [vmem:[%s2016_s2 + $0xa8] sm:$0xff] }
 0x16a   : > { %v305_v14 = vsel %vm304_vm2, %v1629_v12, 128  ;;  %vm948_vm2 = vcmask 31744  }
 0x16b   : > { %v307_v15 = vshra.s32 %v305_v14, 16  ;;  %v306_v30 = vand.u32 65535, %v305_v14 }
 0x16d   : > { %v309_v16 = vcvt.s32.f32 %v307_v15  ;;  %v308_v32 = vcvt.s32.f32 %v306_v30  ;;  %v1078_v15 = vld [vmem:[%s2016_s2 + $0x90] sm:$0xff] }
 0x16f   : > { %310 = vmin.xlane.f32.xlu0 %v309_v16 }
 0x1f8   : > { %v311_v31 = vpop.xlane.xlu0 %310 }
 0x1f9   : > { %vm312_vm3 = vcmp.eq.f32.partialorder %v309_v16, %v311_v31  ;;  %v317_v38 = vcvt.f32.s32 %v311_v31  ;;  %v1077_v16 = vld [vmem:[%s2016_s2 + $0x88] sm:$0xff]  ;;  %v1100_v31 = vld [vmem:[%s2017_s3 + $0x2] ss:$0 sm:$0xff] }
 0x1fa   : > { %v313_v33 = vsel %vm312_vm3, %v308_v32, inf }
 0x1fb   : > { %314 = vmin.xlane.f32.xlu1 %v313_v33  ;;  %v318_v40 = vshll.u32 %v317_v38, 16 }
 0x284   : > { %v315_v39 = vpop.xlane.xlu1 %314 }
 0x285   : > { %v316_v41 = vcvt.f32.s32 %v315_v39 }
 0x287   : > { %v1700_v42 = vadd.s32 %v318_v40, %v316_v41  ;;  %v1117_v41 = vld [vmem:[%s2016_s2 + $0x178] sm:$0xff] }
 0x289   : > { %vm320_vm4 = vcmp.eq.s32.totalorder %v1629_v12, %v1700_v42  ;;  %v411_v24 = vsel %vm410_vm7, %v1700_v42, 0  ;;  %v1116_v42 = vld [vmem:[%s2016_s2 + $0x170] sm:$0xff] }
 0x28a   : > { %1270 = vmatmul.mubr.msk.f32.vlgmr.msra.gmra.mxu1 %vm320_vm4, %v1515_v43 }
 0x28b   : > { %1319 = vmatprep.mubr.msk.bf16.mxu1 %vm1514_vm0, %v1513_v1  ;;  %1316 = vmatpush3.bf16.msra.mxu1 %v1447_v18 }
 0x28c   : > { %1317 = vmatprep.subr.bf16.mxu1 %v1513_v1 }
 0x28f   : > { %1318 = vmatpush3.bf16.msra.mxu1 %v1448_v26  ;;  %v1140_v26 = vld [vmem:[%s2016_s2 + $0x1e0] sm:$0xff] }
 0x290   : > { %1323 = vmatprep.subr.mxu1 %v1513_v1 }
 0x34a   : > { %v405_v45 = vpop.f32.mrf.mxu1 }
 0x34b   : > { %v1712_v46 = vsub.f32 %v1619_v3, %v405_v45  ;;  %v1114_v45 = vld [vmem:[%s2016_s2 + $0x160] sm:$0xff] }
 0x34c   : > { %v1271_v47 = vpop.f32.mrf.mxu1 }
 0x34d   : > { %v417_v48 = vpack.c.bf16 %v1712_v46, %v1712_v46  ;;  %v1112_v47 = vld [vmem:[%s2016_s2 + $0x150] sm:$0xff] }
 0x34f   : > { %1277 = vmatmul.mubr.msk.bf16.vlgmr.msra.gmra.mxu0 %vm252_vm1, %v417_v48  ;;  %v1111_v48 = vld [vmem:[%s2016_s2 + $0x148] sm:$0xff] }
 0x350   : > { %1312 = vmatprep.mubr.msk.f32.mxu0 %vm1514_vm0, %v1513_v1  ;;  %1281 = vmatpush3.msra.mxu0 %v1091_v59  ;;  %v1104_v59 = vld [vmem:[%s2016_s2 + $0x110] sm:$0xff] }
 0x351   : > { %1282 = vmatprep.subr.mxu0 %v1513_v1 }
 0x352   : > { %1283 = vmatpush3.msra.mxu0 %v1090_v60  ;;  %v1103_v60 = vld [vmem:[%s2016_s2 + $0x108] sm:$0xff] }
 0x353   : > { %1284 = vmatprep.subr.mxu0 %v1513_v1 }
 0x354   : > { %1285 = vmatpush3.msra.mxu0 %v1089_v61  ;;  %v1102_v61 = vld [vmem:[%s2016_s2 + $0x100] sm:$0xff] }
 0x355   : > { %1286 = vmatprep.subr.mxu0 %v1513_v1 }
 0x356   : > { %1287 = vmatpush3.msra.mxu0 %v1088_v62  ;;  %v1449_v62 = vld [vmem:[%s2015_s1 + $0x38] sm:$0xff]  }
 0x357   : > { %1288 = vmatprep.subr.mxu0 %v1513_v1 }
 0x358   : > { %1289 = vmatpush3.msra.mxu0 %v1087_v63 }
 0x359   : > { %1290 = vmatprep.subr.mxu0 %v1513_v1 }
 0x35a   : > { %1291 = vmatpush3.msra.mxu0 %v1086_v0 }
 0x35b   : > { %1292 = vmatprep.subr.mxu0 %v1513_v1 }
 0x35c   : > { %1293 = vmatpush3.msra.mxu0 %v1085_v2 }
 0x35d   : > { %1294 = vmatprep.subr.mxu0 %v1513_v1 }
 0x35e   : > { %1295 = vmatpush3.msra.mxu0 %v1084_v4 }
 0x35f   : > { %1296 = vmatprep.subr.mxu0 %v1513_v1 }
 0x360   : > { %1297 = vmatpush3.msra.mxu0 %v1083_v5 }
 0x361   : > { %1298 = vmatprep.subr.mxu0 %v1513_v1 }
 0x362   : > { %1299 = vmatpush3.msra.mxu0 %v1082_v6 }
 0x363   : > { %1300 = vmatprep.subr.mxu0 %v1513_v1 }
 0x364   : > { %1301 = vmatpush3.msra.mxu0 %v1081_v7  ;;  %v1450_v7 = vld [vmem:[%s2015_s1 + $0x30] sm:$0xff]  }
 0x365   : > { %1302 = vmatprep.subr.mxu0 %v1513_v1 }
 0x366   : > { %1303 = vmatpush3.msra.mxu0 %v1080_v8 }
 0x367   : > { %1304 = vmatprep.subr.mxu0 %v1513_v1 }
 0x368   : > { %1305 = vmatpush3.msra.mxu0 %v1079_v9 }
 0x369   : > { %1306 = vmatprep.subr.mxu0 %v1513_v1 }
 0x36a   : > { %1307 = vmatpush3.msra.mxu0 %v1078_v15 }
 0x36b   : > { %1308 = vmatprep.subr.mxu0 %v1513_v1 }
 0x36c   : > { %1309 = vmatpush3.msra.mxu0 %v1077_v16 }
 0x36d   : > { %1310 = vmatprep.subr.mxu0 %v1513_v1 }
 0x36e   : > { %1311 = vmatpush3.msra.mxu0 %v1076_v17 }
 0x36f   : > { %1358 = vmatprep.subr.bf16.mxu0 %v1513_v1 }
 0x40f   : > { %v467_v50 = vpop.f32.mrf.mxu0 }
 0x410   : > { %v478_v51 = vsub.f32 %v1074_v49, %v467_v50  ;;  %v1110_v49 = vld [vmem:[%s2016_s2 + $0x140] sm:$0xff]  ;;  %v1109_v50 = vld [vmem:[%s2016_s2 + $0x138] sm:$0xff] }
 0x411   : > { %v1278_v52 = vpop.f32.mrf.mxu0 }
 0x412   : > { %479 = vmin.xlane.f32.xlu1 %v478_v51  ;;  %v1107_v52 = vld [vmem:[%s2016_s2 + $0x128] sm:$0xff] }
 0x413   : > { %v470_v53 = vpop.f32.mrf.mxu0 }
 0x414   : > { %v1106_v53 = vld [vmem:[%s2016_s2 + $0x120] sm:$0xff] }
 0x415   : > { %v1279_v54 = vpop.f32.mrf.mxu0 }
 0x416   : > { %v1105_v54 = vld [vmem:[%s2016_s2 + $0x118] sm:$0xff] }
 0x49b   : > { %v480_v55 = vpop.xlane.xlu1 %479 }
 0x49c   : > { %vm481_vm5 = vcmp.eq.f32.partialorder %v478_v51, %v480_v55  ;;  %v1108_v51 = vld [vmem:[%s2016_s2 + $0x130] sm:$0xff] }
 0x49d   : > { %v482_v56 = vsel %vm481_vm5, %v1629_v12, 128 }
 0x49e   : > { %v484_v57 = vshra.s32 %v482_v56, 16  ;;  %v483_v10 = vand.u32 65535, %v482_v56 }
 0x4a0   : > { %v486_v58 = vcvt.s32.f32 %v484_v57  ;;  %v485_v13 = vcvt.s32.f32 %v483_v10 }
 0x4a2   : > { %487 = vmin.xlane.f32.xlu0 %v486_v58 }
 0x52b   : > { %v488_v11 = vpop.xlane.xlu0 %487 }
 0x52c   : > { %vm489_vm6 = vcmp.eq.f32.partialorder %v486_v58, %v488_v11  ;;  %v494_v19 = vcvt.f32.s32 %v488_v11 }
 0x52d   : > { %v490_v14 = vsel %vm489_vm6, %v485_v13, inf  ;;  %v1126_v13 = vld [vmem:[%s2017_s3 + $0x3] ss:$0 sm:$0xff] }
 0x52e   : > { %491 = vmin.xlane.f32.xlu1 %v490_v14  ;;  %v495_v21 = vshll.u32 %v494_v19, 16 }
 0x5b7   : > { %v492_v20 = vpop.xlane.xlu1 %491 }
 0x5b8   : > { %v493_v22 = vcvt.f32.s32 %v492_v20 }
 0x5ba   : > { %v496_v23 = vadd.s32 %v495_v21, %v493_v22 }
 0x5bc   : > { %vm497_vm9 = vcmp.eq.s32.totalorder %v1629_v12, %v496_v23  ;;  %v1795_v25 = vsel %vm588_vm8, %v496_v23, %v411_v24  ;;  %v1143_v23 = vld [vmem:[%s2016_s2 + $0x1f8] sm:$0xff]  ;;  %v1142_v24 = vld [vmem:[%s2016_s2 + $0x1f0] sm:$0xff] }
 0x5bd   : > { %1313 = vmatmul.mubr.msk.f32.vlgmr.msra.gmra.mxu0 %vm497_vm9, %v1515_v43 }
 0x5be   : > { %1362 = vmatprep.mubr.msk.bf16.mxu0 %vm1514_vm0, %v1513_v1  ;;  %1359 = vmatpush3.bf16.msra.mxu0 %v1449_v62 }
 0x5bf   : > { %1360 = vmatprep.subr.bf16.mxu0 %v1513_v1 }
 0x5c2   : > { %1361 = vmatpush3.bf16.msra.mxu0 %v1450_v7 }
 0x5c3   : > { %1366 = vmatprep.subr.mxu0 %v1513_v1 }
 0x67d   : > { %v583_v27 = vpop.f32.mrf.mxu0 }
 0x67e   : > { %v1805_v28 = vsub.f32 %v1712_v46, %v583_v27  ;;  %v1113_v46 = vld [vmem:[%s2016_s2 + $0x158] sm:$0xff] }
 0x67f   : > { %v1314_v29 = vpop.f32.mrf.mxu0  ;;  %v1139_v27 = vld [vmem:[%s2016_s2 + $0x1d8] sm:$0xff] }
 0x680   : > { %v595_v30 = vpack.c.bf16 %v1805_v28, %v1805_v28  ;;  %v1137_v29 = vld [vmem:[%s2016_s2 + $0x1c8] sm:$0xff] }
 0x682   : > { %1320 = vmatmul.mubr.msk.bf16.vlgmr.msra.gmra.mxu1 %vm252_vm1, %v595_v30  ;;  %v1136_v30 = vld [vmem:[%s2016_s2 + $0x1c0] sm:$0xff] }
 0x683   : > { %1355 = vmatprep.mubr.msk.f32.mxu1 %vm1514_vm0, %v1513_v1  ;;  %1324 = vmatpush3.msra.mxu1 %v1117_v41  ;;  %v1129_v41 = vld [vmem:[%s2016_s2 + $0x188] sm:$0xff] }
 0x684   : > { %1325 = vmatprep.subr.mxu1 %v1513_v1 }
 0x685   : > { %1326 = vmatpush3.msra.mxu1 %v1116_v42  ;;  %v1128_v42 = vld [vmem:[%s2016_s2 + $0x180] sm:$0xff] }
 0x686   : > { %1327 = vmatprep.subr.mxu1 %v1513_v1 }
 0x687   : > { %1328 = vmatpush3.msra.mxu1 %v1115_v44 }
 0x688   : > { %1329 = vmatprep.subr.mxu1 %v1513_v1 }
 0x689   : > { %1330 = vmatpush3.msra.mxu1 %v1114_v45 }
 0x68a   : > { %1331 = vmatprep.subr.mxu1 %v1513_v1 }
 0x68b   : > { %1332 = vmatpush3.msra.mxu1 %v1113_v46 }
 0x68c   : > { %1333 = vmatprep.subr.mxu1 %v1513_v1 }
 0x68d   : > { %1334 = vmatpush3.msra.mxu1 %v1112_v47 }
 0x68e   : > { %1335 = vmatprep.subr.mxu1 %v1513_v1 }
 0x68f   : > { %1336 = vmatpush3.msra.mxu1 %v1111_v48 }
 0x690   : > { %1337 = vmatprep.subr.mxu1 %v1513_v1 }
 0x691   : > { %1338 = vmatpush3.msra.mxu1 %v1110_v49 }
 0x692   : > { %1339 = vmatprep.subr.mxu1 %v1513_v1 }
 0x693   : > { %1340 = vmatpush3.msra.mxu1 %v1109_v50 }
 0x694   : > { %1341 = vmatprep.subr.mxu1 %v1513_v1 }
 0x695   : > { %1342 = vmatpush3.msra.mxu1 %v1108_v51 }
 0x696   : > { %1343 = vmatprep.subr.mxu1 %v1513_v1 }
 0x697   : > { %1344 = vmatpush3.msra.mxu1 %v1107_v52 }
 0x698   : > { %1345 = vmatprep.subr.mxu1 %v1513_v1 }
 0x699   : > { %1346 = vmatpush3.msra.mxu1 %v1106_v53 }
 0x69a   : > { %1347 = vmatprep.subr.mxu1 %v1513_v1 }
 0x69b   : > { %1348 = vmatpush3.msra.mxu1 %v1105_v54 }
 0x69c   : > { %1349 = vmatprep.subr.mxu1 %v1513_v1 }
 0x69d   : > { %1350 = vmatpush3.msra.mxu1 %v1104_v59 }
 0x69e   : > { %1351 = vmatprep.subr.mxu1 %v1513_v1 }
 0x69f   : > { %1352 = vmatpush3.msra.mxu1 %v1103_v60 }
 0x6a0   : > { %1353 = vmatprep.subr.mxu1 %v1513_v1 }
 0x6a1   : > { %1354 = vmatpush3.msra.mxu1 %v1102_v61 }
 0x742   : > { %v645_v32 = vpop.f32.mrf.mxu1 }
 0x743   : > { %v656_v33 = vsub.f32 %v1100_v31, %v645_v32  ;;  %v1135_v31 = vld [vmem:[%s2016_s2 + $0x1b8] sm:$0xff]  ;;  %v1134_v32 = vld [vmem:[%s2016_s2 + $0x1b0] sm:$0xff] }
 0x744   : > { %v1321_v34 = vpop.f32.mrf.mxu1 }
 0x745   : > { %657 = vmin.xlane.f32.xlu0 %v656_v33  ;;  %v1132_v34 = vld [vmem:[%s2016_s2 + $0x1a0] sm:$0xff] }
 0x746   : > { %v648_v35 = vpop.f32.mrf.mxu1 }
 0x747   : > { %v1131_v35 = vld [vmem:[%s2016_s2 + $0x198] sm:$0xff] }
 0x748   : > { %v1322_v36 = vpop.f32.mrf.mxu1 }
 0x7ce   : > { %v658_v37 = vpop.xlane.xlu0 %657 }
 0x7cf   : > { %vm659_vm10 = vcmp.eq.f32.partialorder %v656_v33, %v658_v37  ;;  %v1133_v33 = vld [vmem:[%s2016_s2 + $0x1a8] sm:$0xff] }
 0x7d0   : > { %v660_v38 = vsel %vm659_vm10, %v1629_v12, 128 }
 0x7d1   : > { %v662_v39 = vshra.s32 %v660_v38, 16  ;;  %v661_v55 = vand.u32 65535, %v660_v38 }
 0x7d3   : > { %v664_v40 = vcvt.s32.f32 %v662_v39  ;;  %v663_v57 = vcvt.s32.f32 %v661_v55 }
 0x7d5   : > { %665 = vmin.xlane.f32.xlu1 %v664_v40 }
 0x85e   : > { %v666_v56 = vpop.xlane.xlu1 %665 }
 0x85f   : > { %vm667_vm11 = vcmp.eq.f32.partialorder %v664_v40, %v666_v56  ;;  %v672_v63 = vcvt.f32.s32 %v666_v56  ;;  %v1130_v40 = vld [vmem:[%s2016_s2 + $0x190] sm:$0xff] }
 0x860   : > { %v668_v58 = vsel %vm667_vm11, %v663_v57, inf }
 0x861   : > { %669 = vmin.xlane.f32.xlu0 %v668_v58  ;;  %v673_v2 = vshll.u32 %v672_v63, 16 }
 0x8ea   : > { %v670_v0 = vpop.xlane.xlu0 %669 }
 0x8eb   : > { %v671_v4 = vcvt.f32.s32 %v670_v0 }
 0x8ed   : > { %v674_v5 = vadd.s32 %v673_v2, %v671_v4 }
 0x8ef   : > { %vm675_vm13 = vcmp.eq.s32.totalorder %v1629_v12, %v674_v5  ;;  %v1886_v6 = vsel %vm766_vm12, %v674_v5, %v1795_v25  ;;  %v1141_v25 = vld [vmem:[%s2016_s2 + $0x1e8] sm:$0xff] }
 0x8f0   : > { %1356 = vmatmul.mubr.msk.f32.vlgmr.msra.gmra.mxu1 %vm675_vm13, %v1515_v43 }
 0x9b0   : > { %v761_v8 = vpop.f32.mrf.mxu1 }
 0x9b1   : > { %v1894_v9 = vsub.f32 %v1805_v28, %v761_v8  ;;  %v1138_v28 = vld [vmem:[%s2016_s2 + $0x1d0] sm:$0xff] }
 0x9b2   : > { %v1357_v10 = vpop.f32.mrf.mxu1 }
 0x9b3   : > { %v773_v11 = vpack.c.bf16 %v1894_v9, %v1894_v9 }
 0x9b5   : > { %1363 = vmatmul.mubr.msk.bf16.vlgmr.msra.gmra.mxu0 %vm252_vm1, %v773_v11 }
 0x9b6   : > { %1398 = vmatprep.mubr.msk.f32.mxu0 %vm1514_vm0, %v1513_v1  ;;  %1367 = vmatpush3.msra.mxu0 %v1143_v23  ;;  %vm944_vm0 = vcmp.eq.s32.totalorder %v1629_v12, 3 }
 0x9b7   : > { %1368 = vmatprep.subr.mxu0 %v1513_v1 }
 0x9b8   : > { %1369 = vmatpush3.msra.mxu0 %v1142_v24 }
 0x9b9   : > { %1370 = vmatprep.subr.mxu0 %v1513_v1 }
 0x9ba   : > { %1371 = vmatpush3.msra.mxu0 %v1141_v25 }
 0x9bb   : > { %1372 = vmatprep.subr.mxu0 %v1513_v1 }
 0x9bc   : > { %1373 = vmatpush3.msra.mxu0 %v1140_v26 }
 0x9bd   : > { %1374 = vmatprep.subr.mxu0 %v1513_v1 }
 0x9be   : > { %1375 = vmatpush3.msra.mxu0 %v1139_v27 }
 0x9bf   : > { %1376 = vmatprep.subr.mxu0 %v1513_v1 }
 0x9c0   : > { %1377 = vmatpush3.msra.mxu0 %v1138_v28 }
 0x9c1   : > { %1378 = vmatprep.subr.mxu0 %v1513_v1 }
 0x9c2   : > { %1379 = vmatpush3.msra.mxu0 %v1137_v29 }
 0x9c3   : > { %1380 = vmatprep.subr.mxu0 %v1513_v1 }
 0x9c4   : > { %1381 = vmatpush3.msra.mxu0 %v1136_v30 }
 0x9c5   : > { %1382 = vmatprep.subr.mxu0 %v1513_v1 }
 0x9c6   : > { %1383 = vmatpush3.msra.mxu0 %v1135_v31 }
 0x9c7   : > { %1384 = vmatprep.subr.mxu0 %v1513_v1 }
 0x9c8   : > { %1385 = vmatpush3.msra.mxu0 %v1134_v32 }
 0x9c9   : > { %1386 = vmatprep.subr.mxu0 %v1513_v1 }
 0x9ca   : > { %1387 = vmatpush3.msra.mxu0 %v1133_v33 }
 0x9cb   : > { %1388 = vmatprep.subr.mxu0 %v1513_v1 }
 0x9cc   : > { %1389 = vmatpush3.msra.mxu0 %v1132_v34 }
 0x9cd   : > { %1390 = vmatprep.subr.mxu0 %v1513_v1 }
 0x9ce   : > { %1391 = vmatpush3.msra.mxu0 %v1131_v35 }
 0x9cf   : > { %1392 = vmatprep.subr.mxu0 %v1513_v1 }
 0x9d0   : > { %1393 = vmatpush3.msra.mxu0 %v1130_v40 }
 0x9d1   : > { %1394 = vmatprep.subr.mxu0 %v1513_v1 }
 0x9d2   : > { %1395 = vmatpush3.msra.mxu0 %v1129_v41 }
 0x9d3   : > { %1396 = vmatprep.subr.mxu0 %v1513_v1 }
 0x9d4   : > { %1397 = vmatpush3.msra.mxu0 %v1128_v42 }
 0xa75   : > { %v823_v14 = vpop.f32.mrf.mxu0 }
 0xa76   : > { %v834_v15 = vsub.f32 %v1126_v13, %v823_v14 }
 0xa77   : > { %v1364_v16 = vpop.f32.mrf.mxu0 }
 0xa78   : > { %835 = vmin.xlane.f32.xlu1 %v834_v15 }
 0xa79   : > { %v826_v17 = vpop.f32.mrf.mxu0 }
 0xa7b   : > { %v1365_v18 = vpop.f32.mrf.mxu0 }
 0xb01   : > { %v836_v19 = vpop.xlane.xlu1 %835 }
 0xb02   : > { %vm837_vm14 = vcmp.eq.f32.partialorder %v834_v15, %v836_v19 }
 0xb03   : > { %v838_v20 = vsel %vm837_vm14, %v1629_v12, 128 }
 0xb04   : > { %v840_v21 = vshra.s32 %v838_v20, 16  ;;  %v839_v36 = vand.u32 65535, %v838_v20 }
 0xb06   : > { %v842_v22 = vcvt.s32.f32 %v840_v21  ;;  %v841_v38 = vcvt.s32.f32 %v839_v36 }
 0xb08   : > { %843 = vmin.xlane.f32.xlu0 %v842_v22 }
 0xb91   : > { %v844_v37 = vpop.xlane.xlu0 %843 }
 0xb92   : > { %vm845_vm15 = vcmp.eq.f32.partialorder %v842_v22, %v844_v37  ;;  %v850_v44 = vcvt.f32.s32 %v844_v37 }
 0xb93   : > { %v846_v39 = vsel %vm845_vm15, %v841_v38, inf }
 0xb94   : > { %847 = vmin.xlane.f32.xlu1 %v846_v39  ;;  %v851_v46 = vshll.u32 %v850_v44, 16 }
 0xc1d   : > { %v848_v45 = vpop.xlane.xlu1 %847 }
 0xc1e   : > { %v849_v47 = vcvt.f32.s32 %v848_v45 }
 0xc20   : > { %v852_v48 = vadd.s32 %v851_v46, %v849_v47 }
 0xc22   : > { %vm853_vm3 = vcmp.eq.s32.totalorder %v1629_v12, %v852_v48  ;;  %v945_v1 = vsel %vm944_vm0, %v852_v48, %v1886_v6 }
 0xc23   : > { %949 = vst.msk [vmem:[%s230_s8] sm:$0xff] %vm948_vm2, %v945_v1  ;;  %1399 = vmatmul.mubr.msk.f32.vlgmr.msra.gmra.mxu0 %vm853_vm3, %v1515_v43 }
 0xce3   : > { %v939_v49 = vpop.f32.mrf.mxu0 }
 0xce4   : > { %v943_v50 = vsub.f32 %v1894_v9, %v939_v49 }
 0xce5   : > { %v1400_v51 = vpop.f32.mrf.mxu0 }
 0xce6   : > { %v946_v52 = vsub.f32 %v1619_v3, %v943_v50 }
 0xce8   : > { %947 = vst.msk [vmem:[%s216_s14] sm:$0xff] %vm252_vm1, %v946_v52 }
 0xce9   : > { %1464 = shalt.err (!%p1461_p3)
}
 0xcea   : > { %s1465_s30 = scalar_lea.hbm %s966_s16, 128  ;;  %s1469_s8 = scalar_lea.hbm %s2018_s4, 384 }
 0xceb   : > { %p1466_p4 = scmp.ne.s32.totalorder %s966_s16, %s1465_s30  ;;  %p1470_p9 = scmp.lt.s32.totalorder %s966_s16, %s2018_s4 }
 0xcec   : > { %p1471_p10 = scmp.lt.s32.totalorder %s1469_s8, %s1465_s30 }
 0xced   : > { %p1467_p7 = pnand %p1466_p4, %p1585_p5 }
 0xcee   : > { %p1472_p11 = por %p1471_p10, %p1470_p9 }
 0xcef   : > { %p1468_p8 = pneg %p1467_p7 }
 0xcf1   : > { %p1473_p12 = pnand %p1472_p11, %p1468_p8 }
 0xcf3   : > { %1476 = shalt.err (!%p1473_p12)
}
 0xcf4   : > { %1401 = dma.vmem_to_hbm [thread:$0]  (%p1585_p5), %s969_s9, 128, %s966_s16, %s951_s17  }
 0xcf5 PF: > { %p1407_p13 = scmp.ge.s32.totalorder %s1511_s21, 2  ;;  %s983_s13 = sand.u32 1, %s1499_s18  }
 0xcf6   : > { %s984_s14 = scalar_lea.sflag [#allocation3], %s983_s13 }
 0xcf7   : > { %p1404_p0 = pnand %p1407_p13, %p1589_p6 }
 0xcf9   : > { %p1405_p1 = pneg %p1404_p0 }
 0xcfb   : > { %1494 = dma.done.wait (%p1405_p1), %s984_s14, 128  }
 0xcfc   : > { %1496 = vsyncadd (%p1405_p1), %s984_s14, 4294967168  ;;  %p16_p2 = scmp.ge.s32.totalorder %s1572_s24, 5   ;;  %s2022_s18 = smov %s1503_s19 }
 0xcfd   : > { %s2023_s19 = smov %s1507_s20  ;;  %s2024_s20 = smov %s1583_s27 }
 0xcfe   : > { %s2025_s21 = smov %s1572_s24  ;;  %18 = sbr.rel (!%p16_p2) target bundleno = 3 (0x3), region = 89 }
 0xd03   :  { %996 = vsyncpa [#allocation3], 1 }
 0xd04   :  { %998 = vsyncpa [#allocation3 + $0x1], 1 }

</bundles_post_ra>
